<compile_context>
chip_gen: v7x
topology: tpu7x:2x2x1
jax: 0.10.0
libtpu: 0.0.40
codegen_flags: <defaults>
</compile_context>

<pallas_src>
import functools

import jax
import jax.numpy as jnp
from jax import lax
from jax.experimental import pallas as pl
from jax.experimental.pallas import tpu as pltpu


def _geo_loss_kernel(rgb_ref, gt_ref, mask_ref, num_ref, den_ref, *,
                     n_total, block_n, blocks_per_split, needs_tail_mask):
    """One lane-dense (3, block_n) tile of the masked-L1 reduction.

    Grid: (splits [parallel], blocks_per_split [arbitrary / reduction]).
      rgb_ref, gt_ref : (3, block_n) rgb tiles (channels on sublanes, rays on lanes)
      mask_ref        : (1, block_n) render-mask tile
      num_ref, den_ref: (1, 1, 1)    per-split partial sums (resident accumulators)
    """
    c = pl.program_id(0)          # split (megacore axis)
    i = pl.program_id(1)          # block within split (reduction axis)

    @pl.when(i == 0)
    def _init():
        num_ref[...] = jnp.zeros_like(num_ref)
        den_ref[...] = jnp.zeros_like(den_ref)

    a = rgb_ref[...].astype(jnp.float32)      # (3, block_n)
    b = gt_ref[...].astype(jnp.float32)       # (3, block_n)
    m = mask_ref[...].astype(jnp.float32)     # (1, block_n)
    d = jnp.abs(a - b)                        # (3, block_n)

    if needs_tail_mask:
        # Grid over-covers N: zero lanes whose *logical* ray index >= N.
        # (jnp.where, not a multiply, so stale/garbage lanes cannot leak NaNs.)
        col0 = (c * blocks_per_split + i) * block_n
        lane = lax.broadcasted_iota(jnp.int32, m.shape, dimension=1)
        valid = (lane + col0) < n_total
        m = jnp.where(valid, m, 0.0)
        d = jnp.where(valid, d, 0.0)

    # Per-step tree reduction to scalars; accumulate into the resident outputs.
    s_num = jnp.sum(d * m, keepdims=True).reshape(1, 1, 1)
    s_den = jnp.sum(m, keepdims=True).reshape(1, 1, 1)
    num_ref[...] += s_num
    den_ref[...] += s_den


def geo_loss(slf_rgb, rgb_gt, masks, rf_loss_scale_mod=1.0, *,
             block_n=65536, num_splits=1, vmem_limit_bytes=32 * 1024 * 1024):
    """Pallas GeoLoss.forward.

    slf_rgb, rgb_gt : (3, N) channel-major rgb (fast path).  Row-major (N, 3)
                      is accepted but costs an extra transpose pass over HBM.
    masks           : (N,) render masks (bool / float / bf16).
    """
    if slf_rgb.ndim == 2 and slf_rgb.shape[0] != 3 and slf_rgb.shape[1] == 3:
        # Compatibility path for row-major (N, 3): re-adds ~2 HBM passes;
        # prefer channel-major (3, N) straight from the renderer.
        slf_rgb = slf_rgb.T
        rgb_gt = rgb_gt.T
    assert slf_rgb.shape[0] == 3 and rgb_gt.shape == slf_rgb.shape
    n = slf_rgb.shape[1]
    assert masks.shape == (n,)

    if masks.dtype == jnp.bool_:
        # Matches the reference .float(); also avoids shipping an i1 block.
        masks = masks.astype(jnp.float32)
    mask_row = masks.reshape(1, n)            # free reshape, no data movement

    # Block size: one full-width block for small N, else a multiple of 128.
    if n <= block_n:
        bn = n
    else:
        bn = max(128, (block_n // 128) * 128)
    nb = pl.cdiv(n, bn)
    splits = max(1, min(num_splits, nb))
    nps = pl.cdiv(nb, splits)                 # blocks per split
    needs_tail_mask = (splits * nps * bn) != n

    last_block = nb - 1

    def in_map(c, i):
        # Clamp so excess blocks (logical start >= N) re-read a valid block;
        # the in-kernel iota mask zeroes their contribution.
        return (0, jnp.minimum(c * nps + i, last_block))

    def out_map(c, i):
        return (c, 0, 0)

    kernel = functools.partial(
        _geo_loss_kernel, n_total=n, block_n=bn,
        blocks_per_split=nps, needs_tail_mask=needs_tail_mask)

    num_part, den_part = pl.pallas_call(
        kernel,
        out_shape=(
            jax.ShapeDtypeStruct((splits, 1, 1), jnp.float32),
            jax.ShapeDtypeStruct((splits, 1, 1), jnp.float32),
        ),
        grid_spec=pltpu.PrefetchScalarGridSpec(
            num_scalar_prefetch=0,
            grid=(splits, nps),
            in_specs=[
                pl.BlockSpec((3, bn), in_map),
                pl.BlockSpec((3, bn), in_map),
                pl.BlockSpec((1, bn), in_map),
            ],
            out_specs=(
                pl.BlockSpec((1, 1, 1), out_map),
                pl.BlockSpec((1, 1, 1), out_map),
            ),
        ),
        compiler_params=pltpu.CompilerParams(
            dimension_semantics=("parallel", "arbitrary"),
            vmem_limit_bytes=vmem_limit_bytes,
        ),
    )(slf_rgb, rgb_gt, mask_row)

    num = jnp.sum(num_part)
    den = jnp.sum(den_part)
    mask_sum = jnp.maximum(den, jnp.float32(1e-07))       # .clamp(min=1e-7)
    return num / mask_sum / 3.0 * rf_loss_scale_mod


def geo_loss_ref(slf_rgb_cm, rgb_gt_cm, masks, rf_loss_scale_mod=1.0):
    m = masks.astype(jnp.float32)
    mask_sum = jnp.maximum(m.sum(), 1e-07)
    diff = jnp.abs(slf_rgb_cm.astype(jnp.float32) - rgb_gt_cm.astype(jnp.float32))
    return (diff * m[None, :]).sum() / mask_sum / 3.0 * rf_loss_scale_mod


if __name__ == "__main__":
    key = jax.random.PRNGKey(0)
    ks = jax.random.split(key, 9)

    # Case 1: small ragged N, single full-width block (bn == n), f32 inputs.
    n1 = 1000
    rgb1 = jax.random.uniform(ks[0], (3, n1), dtype=jnp.float32)
    gt1 = jax.random.uniform(ks[1], (3, n1), dtype=jnp.float32)
    m1 = (jax.random.uniform(ks[2], (n1,)) > 0.5).astype(jnp.float32)
    out1 = jax.block_until_ready(geo_loss(rgb1, gt1, m1, 1.0))
    ref1 = geo_loss_ref(rgb1, gt1, m1, 1.0)
    assert jnp.allclose(out1, ref1, rtol=1e-5, atol=1e-6), (out1, ref1)

    # Case 2: multi-block grid with a ragged tail (in-kernel iota mask), bf16 inputs.
    n2 = 3000
    rgb2 = jax.random.uniform(ks[3], (3, n2), dtype=jnp.float32).astype(jnp.bfloat16)
    gt2 = jax.random.uniform(ks[4], (3, n2), dtype=jnp.float32).astype(jnp.bfloat16)
    m2 = (jax.random.uniform(ks[5], (n2,)) > 0.3).astype(jnp.bfloat16)
    out2 = jax.block_until_ready(geo_loss(rgb2, gt2, m2, 0.5, block_n=512))
    ref2 = geo_loss_ref(rgb2, gt2, m2, 0.5)
    assert jnp.allclose(out2, ref2, rtol=1e-4, atol=1e-4), (out2, ref2)

    # Case 3: 2-way split ("parallel" leading axis) plus an excess block whose
    # logical start is past N (exercises the index-map clamp + zero contribution),
    # bool masks cast in the wrapper.
    n3 = 2560
    rgb3 = jax.random.uniform(ks[6], (3, n3), dtype=jnp.float32)
    gt3 = jax.random.uniform(ks[7], (3, n3), dtype=jnp.float32)
    m3 = jax.random.uniform(ks[8], (n3,)) > 0.5
    out3 = jax.block_until_ready(
        geo_loss(rgb3, gt3, m3, 1.25, block_n=512, num_splits=2))
    ref3 = geo_loss_ref(rgb3, gt3, m3.astype(jnp.float32), 1.25)
    assert jnp.allclose(out3, ref3, rtol=1e-5, atol=1e-6), (out3, ref3)

    print("KERNEL_OK")
</pallas_src>

<mosaic_0001>
module attributes {stable_mosaic.version = 11 : i64} {
  func.func @_geo_loss_kernel(%arg0: i32, %arg1: i32, %arg2: memref<3x1000xf32, #tpu.memory_space<vmem>>, %arg3: memref<3x1000xf32, #tpu.memory_space<vmem>>, %arg4: memref<1x1000xf32, #tpu.memory_space<vmem>>, %arg5: memref<1x1x1xf32, #tpu.memory_space<vmem>>, %arg6: memref<1x1x1xf32, #tpu.memory_space<vmem>>) attributes {dimension_semantics = [#tpu.dimension_semantics<parallel>, #tpu.dimension_semantics<arbitrary>], iteration_bounds = array<i64: 1, 1>, scalar_prefetch = 0 : i64, scratch_operands = 0 : i64, tpu.core_type = #tpu.core_type<tc>, window_params = [{transform_indices = @transform_0, window_bounds = array<i64: 3, 1000>}, {transform_indices = @transform_1, window_bounds = array<i64: 3, 1000>}, {transform_indices = @transform_2, window_bounds = array<i64: 1, 1000>}, {transform_indices = @transform_3, window_bounds = array<i64: 1, 1, 1>}, {transform_indices = @transform_4, window_bounds = array<i64: 1, 1, 1>}]} {
    %c0_i32 = arith.constant 0 : i32
    %0 = arith.cmpi eq, %arg1, %c0_i32 : i32
    %1 = arith.extui %0 : i1 to i32
    %c0_i32_0 = arith.constant 0 : i32
    %2 = arith.cmpi ne, %1, %c0_i32_0 : i32
    scf.if %2 {
      %cst_19 = arith.constant 0.000000e+00 : f32
      %28 = vector.broadcast %cst_19 : f32 to vector<1x1x1xf32>
      %c0_20 = arith.constant 0 : index
      %c0_21 = arith.constant 0 : index
      %c0_22 = arith.constant 0 : index
      %29 = vector.load %arg5[%c0_20, %c0_21, %c0_22] : memref<1x1x1xf32, #tpu.memory_space<vmem>>, vector<1x1x1xf32>
      tpu.vector_store %arg5[%c0_20, %c0_21, %c0_22], %28 {strides = array<i32>} : memref<1x1x1xf32, #tpu.memory_space<vmem>>, vector<1x1x1xf32>,
      %cst_23 = arith.constant 0.000000e+00 : f32
      %30 = vector.broadcast %cst_23 : f32 to vector<1x1x1xf32>
      %c0_24 = arith.constant 0 : index
      %c0_25 = arith.constant 0 : index
      %c0_26 = arith.constant 0 : index
      %31 = vector.load %arg6[%c0_24, %c0_25, %c0_26] : memref<1x1x1xf32, #tpu.memory_space<vmem>>, vector<1x1x1xf32>
      tpu.vector_store %arg6[%c0_24, %c0_25, %c0_26], %30 {strides = array<i32>} : memref<1x1x1xf32, #tpu.memory_space<vmem>>, vector<1x1x1xf32>,
    } else {
    }
    %c0 = arith.constant 0 : index
    %c0_1 = arith.constant 0 : index
    %3 = vector.load %arg2[%c0, %c0_1] : memref<3x1000xf32, #tpu.memory_space<vmem>>, vector<3x1000xf32>
    %c0_2 = arith.constant 0 : index
    %c0_3 = arith.constant 0 : index
    %4 = vector.load %arg3[%c0_2, %c0_3] : memref<3x1000xf32, #tpu.memory_space<vmem>>, vector<3x1000xf32>
    %c0_4 = arith.constant 0 : index
    %c0_5 = arith.constant 0 : index
    %5 = vector.load %arg4[%c0_4, %c0_5] : memref<1x1000xf32, #tpu.memory_space<vmem>>, vector<1x1000xf32>
    %6 = arith.subf %3, %4 : vector<3x1000xf32>
    %7 = math.absf %6 : vector<3x1000xf32>
    %8 = vector.broadcast %5 : vector<1x1000xf32> to vector<3x1000xf32>
    %9 = arith.mulf %7, %8 : vector<3x1000xf32>
    %10 = vector.shape_cast %9 : vector<3x1000xf32> to vector<1x3x1000xf32>
    %cst = arith.constant dense<0.000000e+00> : vector<1xf32>
    %11 = vector.multi_reduction <add>, %10, %cst [1, 2] : vector<1x3x1000xf32> to vector<1xf32>
    %12 = vector.shape_cast %11 : vector<1xf32> to vector<1x1x1xf32>
    %13 = vector.extract %12[0, 0, 0] : f32 from vector<1x1x1xf32>
    %14 = vector.broadcast %13 : f32 to vector<1x1xf32>
    %15 = vector.shape_cast %14 : vector<1x1xf32> to vector<1x1x1xf32>
    %16 = vector.shape_cast %5 : vector<1x1000xf32> to vector<1x1x1000xf32>
    %cst_6 = arith.constant dense<0.000000e+00> : vector<1xf32>
    %17 = vector.multi_reduction <add>, %16, %cst_6 [1, 2] : vector<1x1x1000xf32> to vector<1xf32>
    %18 = vector.shape_cast %17 : vector<1xf32> to vector<1x1x1xf32>
    %19 = vector.extract %18[0, 0, 0] : f32 from vector<1x1x1xf32>
    %20 = vector.broadcast %19 : f32 to vector<1x1xf32>
    %21 = vector.shape_cast %20 : vector<1x1xf32> to vector<1x1x1xf32>
    %c0_7 = arith.constant 0 : index
    %c0_8 = arith.constant 0 : index
    %c0_9 = arith.constant 0 : index
    %22 = vector.load %arg5[%c0_7, %c0_8, %c0_9] : memref<1x1x1xf32, #tpu.memory_space<vmem>>, vector<1x1x1xf32>
    %23 = arith.addf %22, %15 : vector<1x1x1xf32>
    %c0_10 = arith.constant 0 : index
    %c0_11 = arith.constant 0 : index
    %c0_12 = arith.constant 0 : index
    %24 = vector.load %arg5[%c0_10, %c0_11, %c0_12] : memref<1x1x1xf32, #tpu.memory_space<vmem>>, vector<1x1x1xf32>
    tpu.vector_store %arg5[%c0_10, %c0_11, %c0_12], %23 {strides = array<i32>} : memref<1x1x1xf32, #tpu.memory_space<vmem>>, vector<1x1x1xf32>,
    %c0_13 = arith.constant 0 : index
    %c0_14 = arith.constant 0 : index
    %c0_15 = arith.constant 0 : index
    %25 = vector.load %arg6[%c0_13, %c0_14, %c0_15] : memref<1x1x1xf32, #tpu.memory_space<vmem>>, vector<1x1x1xf32>
    %26 = arith.addf %25, %21 : vector<1x1x1xf32>
    %c0_16 = arith.constant 0 : index
    %c0_17 = arith.constant 0 : index
    %c0_18 = arith.constant 0 : index
    %27 = vector.load %arg6[%c0_16, %c0_17, %c0_18] : memref<1x1x1xf32, #tpu.memory_space<vmem>>, vector<1x1x1xf32>
    tpu.vector_store %arg6[%c0_16, %c0_17, %c0_18], %26 {strides = array<i32>} : memref<1x1x1xf32, #tpu.memory_space<vmem>>, vector<1x1x1xf32>,
    return
  }
  func.func @transform_0(%arg0: i32, %arg1: i32) -> (i32, i32) {
    %c1_i32 = arith.constant 1 : i32
    %0 = arith.muli %arg0, %c1_i32 : i32
    %1 = arith.addi %0, %arg1 : i32
    %c0_i32 = arith.constant 0 : i32
    %2 = arith.minsi %1, %c0_i32 : i32
    %c0_i32_0 = arith.constant 0 : i32
    %c0_i32_1 = arith.constant 0 : i32
    return %c0_i32_0, %2 : i32, i32
  }
  func.func @transform_1(%arg0: i32, %arg1: i32) -> (i32, i32) {
    %c1_i32 = arith.constant 1 : i32
    %0 = arith.muli %arg0, %c1_i32 : i32
    %1 = arith.addi %0, %arg1 : i32
    %c0_i32 = arith.constant 0 : i32
    %2 = arith.minsi %1, %c0_i32 : i32
    %c0_i32_0 = arith.constant 0 : i32
    %c0_i32_1 = arith.constant 0 : i32
    return %c0_i32_0, %2 : i32, i32
  }
  func.func @transform_2(%arg0: i32, %arg1: i32) -> (i32, i32) {
    %c1_i32 = arith.constant 1 : i32
    %0 = arith.muli %arg0, %c1_i32 : i32
    %1 = arith.addi %0, %arg1 : i32
    %c0_i32 = arith.constant 0 : i32
    %2 = arith.minsi %1, %c0_i32 : i32
    %c0_i32_0 = arith.constant 0 : i32
    %c0_i32_1 = arith.constant 0 : i32
    return %c0_i32_0, %2 : i32, i32
  }
  func.func @transform_3(%arg0: i32, %arg1: i32) -> (i32, i32, i32) {
    %c0_i32 = arith.constant 0 : i32
    %c0_i32_0 = arith.constant 0 : i32
    %c0_i32_1 = arith.constant 0 : i32
    return %arg0, %c0_i32, %c0_i32_0 : i32, i32, i32
  }
  func.func @transform_4(%arg0: i32, %arg1: i32) -> (i32, i32, i32) {
    %c0_i32 = arith.constant 0 : i32
    %c0_i32_0 = arith.constant 0 : i32
    %c0_i32_1 = arith.constant 0 : i32
    return %arg0, %c0_i32, %c0_i32_0 : i32, i32, i32
  }
}

</mosaic_0001>

<bundles_post_ra>
// kernel: tpu_custom_call.1
= control target key start
LH: loop header
LB: loop body
LE: loop exit
PB: predicated region body
PF: predicated region fallthrough
CT: control target
= control target key end

     0   :  { %10 = vsyncpa [#allocation3], 0  ;;  %s506_s0 = inlined_call_operand.hbm [shape: f32[3,1000], index: 0, kind: input, shape index: {}]   ;;  %s507_s1 = inlined_call_operand.hbm [shape: f32[3,1000], index: 1, kind: input, shape index: {}]   ;;  %s508_s2 = inlined_call_operand.hbm [shape: f32[1,1000], index: 2, kind: input, shape index: {}]   ;;  %s509_s3 = inlined_call_operand.hbm [shape: f32[1,1,1], index: 3, kind: output, shape index: {0}]   ;;  %s510_s4 = inlined_call_operand.hbm [shape: f32[1,1,1], index: 4, kind: output, shape index: {1}]  }
   0x1   :  { %11 = vsyncpa [#allocation6], 0 }
   0x2   :  { %12 = vsyncpa [#allocation4], 0 }
   0x3   :  { %13 = vsyncpa [#allocation10], 0  ;;  %s397_s15 = smov [#allocation5]   ;;  %s398_s17 = smov [#allocation2]  }
   0x4   :  { %s42_s16 = sshll.u32 %s397_s15, 4  ;;  %s26_s18 = sshll.u32 %s398_s17, 4  ;;  %s43_s16 = int_to_ptr.vmem [resolvable:$true] %s42_s16  ;;  %s27_s18 = int_to_ptr.vmem [resolvable:$true] %s26_s18 }
   0x5   :  { %s279_s21 = scalar_lea.hbm %s507_s1, 512 }
   0x6   :  { %p280_p0 = scmp.ne.s32.totalorder %s507_s1, %s279_s21  ;;  %p283_p1 = scmp.lt.u32.totalorder %s279_s21, %s507_s1 }
   0x8   :  { %p285_p2 = pnand %p283_p1, %p280_p0 }
   0xa   :  { %288 = shalt.err (!%p285_p2)
}
   0xb   :  { %s289_s26 = scalar_lea.vmem %s43_s16, 512  ;;  %p294_p4 = scmp.lt.s32.totalorder %s43_s16, %s43_s16 }
   0xc   :  { %p290_p3 = scmp.ne.s32.totalorder %s43_s16, %s289_s26  ;;  %p295_p5 = scmp.lt.s32.totalorder %s289_s26, %s289_s26 }
   0xe   :  { %p296_p6 = por %p295_p5, %p294_p4 }
  0x10   :  { %p297_p7 = pnand %p296_p6, %p290_p3 }
  0x12   :  { %300 = shalt.err (!%p297_p7)
}
  0x13   :  { %45 = dma.hbm_to_vmem [thread:$0]  %s507_s1, 512, %s43_s16, [#allocation6]  }
  0x14   :  { %s301_s5 = scalar_lea.hbm %s506_s0, 512 }
  0x15   :  { %p302_p8 = scmp.ne.s32.totalorder %s506_s0, %s301_s5  ;;  %p305_p9 = scmp.lt.u32.totalorder %s301_s5, %s506_s0 }
  0x17   :  { %p307_p10 = pnand %p305_p9, %p302_p8 }
  0x19   :  { %310 = shalt.err (!%p307_p10)
}
  0x1a   :  { %s311_s10 = scalar_lea.vmem %s27_s18, 512  ;;  %p316_p12 = scmp.lt.s32.totalorder %s27_s18, %s27_s18 }
  0x1b   :  { %p312_p11 = scmp.ne.s32.totalorder %s27_s18, %s311_s10  ;;  %p317_p13 = scmp.lt.s32.totalorder %s311_s10, %s311_s10 }
  0x1d   :  { %p318_p0 = por %p317_p13, %p316_p12 }
  0x1f   :  { %p319_p1 = pnand %p318_p0, %p312_p11 }
  0x21   :  { %322 = shalt.err (!%p319_p1)
}
  0x22   :  { %29 = dma.hbm_to_vmem [thread:$0]  %s506_s0, 512, %s27_s18, [#allocation3]  }
  0x23   :  { %s399_s12 = smov [#allocation7]   ;;  %s323_s16 = scalar_lea.hbm %s508_s2, 128 }
  0x24   :  { %s58_s13 = sshll.u32 %s399_s12, 4  ;;  %p324_p2 = scmp.ne.s32.totalorder %s508_s2, %s323_s16  ;;  %s59_s13 = int_to_ptr.vmem [resolvable:$true] %s58_s13 }
  0x25   :  { %p327_p3 = scmp.lt.u32.totalorder %s323_s16, %s508_s2 }
  0x27   :  { %p329_p4 = pnand %p327_p3, %p324_p2 }
  0x29   :  { %332 = shalt.err (!%p329_p4)
}
  0x2a   :  { %s333_s22 = scalar_lea.vmem %s59_s13, 128  ;;  %p338_p6 = scmp.lt.s32.totalorder %s59_s13, %s59_s13 }
  0x2b   :  { %p334_p5 = scmp.ne.s32.totalorder %s59_s13, %s333_s22  ;;  %p339_p7 = scmp.lt.s32.totalorder %s333_s22, %s333_s22 }
  0x2d   :  { %p340_p8 = por %p339_p7, %p338_p6 }
  0x2f   :  { %p341_p9 = pnand %p340_p8, %p334_p5 }
  0x31   :  { %344 = shalt.err (!%p341_p9)
}
  0x32   :  { %61 = dma.hbm_to_vmem [thread:$0]  %s508_s2, 128, %s59_s13, [#allocation6]  }
  0x33   :  { %389 = dma.done.wait [#allocation3], 512  }
  0x34   :  { %390 = vsyncadd [#allocation3], 4294966784 }
  0x35   :  { %391 = dma.done.wait [#allocation6], 640  }
  0x36   :  { %392 = vsyncadd [#allocation6], 4294966656  ;;  %v108_v0 = vlaneseq  ;;  %v90_v9 = vld [vmem:[#allocation2] sm:$0x77]  ;;  %v91_v10 = vld [vmem:[#allocation2 + $0x8] sm:$0x77] }
  0x37   :  { %v92_v11 = vld [vmem:[#allocation2 + $0x10] sm:$0x77]  ;;  %v93_v12 = vld [vmem:[#allocation2 + $0x18] sm:$0x77]  ;;  %v94_v13 = vld [vmem:[#allocation5] sm:$0x77] }
  0x38   :  { %v109_v1 = vshrl.u32 %v108_v0, 7  ;;  %v95_v14 = vld [vmem:[#allocation5 + $0x8] sm:$0x77]  ;;  %v96_v15 = vld [vmem:[#allocation5 + $0x10] sm:$0x77]  ;;  %v98_v17 = vld [vmem:[#allocation7] sm:$0xff]  ;;  %v99_v18 = vsub.f32 %v90_v9, %v94_v13 }
  0x39   :  { %v97_v16 = vld [vmem:[#allocation5 + $0x18] sm:$0x77]  ;;  %v100_v19 = vsub.f32 %v91_v10, %v95_v14  ;;  %v101_v21 = vsub.f32 %v92_v11, %v96_v15  ;;  %vm199_vm0 = vcmask 1040384   ;;  %vm164_vm1 = vcmask 1042432   ;;  %s401_s2 = smov [#allocation8]   ;;  %s402_s25 = smov [#allocation9]  }
  0x3a   :  { %v110_v2 = vsub.s32 0, %v109_v1  ;;  %v114_v3 = vsub.s32 1, %v109_v1  ;;  %v118_v4 = vsub.s32 2, %v109_v1  ;;  %v122_v5 = vsub.s32 3, %v109_v1  ;;  %s239_s23 = sshll.u32 %s401_s2, 4  ;;  %s249_s26 = sshll.u32 %s402_s25, 4  ;;  %s240_s23 = int_to_ptr.vmem [resolvable:$true] %s239_s23  ;;  %s250_s26 = int_to_ptr.vmem [resolvable:$true] %s249_s26 }
  0x3b   :  { %v126_v6 = vsub.s32 4, %v109_v1  ;;  %v130_v7 = vsub.s32 5, %v109_v1  ;;  %v134_v8 = vsub.s32 6, %v109_v1  ;;  %v138_v20 = vsub.s32 7, %v109_v1  ;;  %s345_s28 = scalar_lea.vmem %s240_s23, 16  ;;  %s349_s29 = scalar_lea.vmem %s240_s23, 32 }
  0x3c   :  { %v111_v22 = vrot.slane %v98_v17, %v110_v2  ;;  %v115_v23 = vrot.slane %v98_v17, %v114_v3  ;;  %v103_v24 = vand.u32 2147483647, %v99_v18  ;;  %v104_v25 = vand.u32 2147483647, %v100_v19  ;;  %p346_p10 = scmp.ne.s32.totalorder %s240_s23, %s345_s28  ;;  %p350_p11 = scmp.lt.s32.totalorder %s240_s23, %s240_s23 }
  0x3d   :  { %v119_v26 = vrot.slane %v98_v17, %v118_v4  ;;  %v123_v27 = vrot.slane %v98_v17, %v122_v5  ;;  %v102_v28 = vsub.f32 %v93_v12, %v97_v16  ;;  %v105_v29 = vand.u32 2147483647, %v101_v21  ;;  %p351_p12 = scmp.lt.s32.totalorder %s349_s29, %s345_s28 }
  0x3e   :  { %v127_v30 = vrot.slane %v98_v17, %v126_v6  ;;  %v131_v31 = vrot.slane %v98_v17, %v130_v7  ;;  %v135_v32 = vrot.slane %v98_v17, %v134_v8  ;;  %v139_v33 = vrot.slane %v98_v17, %v138_v20 }
  0x3f   :  { %v140_v34 = vcombine.low %v111_v22, %v115_v23  ;;  %v141_v35 = vcombine.low %v119_v26, %v123_v27  ;;  %v200_v37 = vsel %vm199_vm0, %v111_v22, 0.0  ;;  %v201_v38 = vsel %vm199_vm0, %v115_v23, 0.0  ;;  %p352_p13 = por %p351_p12, %p350_p11 }
  0x40   :  { %v142_v36 = vcombine.low %v127_v30, %v131_v31  ;;  %v202_v41 = vadd.f32 %v201_v38, %v200_v37  ;;  %v203_v42 = vsel %vm199_vm0, %v119_v26, 0.0  ;;  %v106_v43 = vand.u32 2147483647, %v102_v28 }
  0x41   :  { %v148_v39 = vmul.f32 %v140_v34, %v103_v24  ;;  %v149_v40 = vmul.f32 %v141_v35, %v104_v25  ;;  %v143_v44 = vcombine.low %v135_v32, %v139_v33  ;;  %v205_v49 = vsel %vm199_vm0, %v123_v27, 0.0  ;;  %p353_p0 = pnand %p352_p13, %p346_p10 }
  0x42   :  { %v150_v45 = vmul.f32 %v142_v36, %v105_v29  ;;  %v204_v50 = vadd.f32 %v203_v42, %v202_v41  ;;  %v207_v53 = vsel %vm199_vm0, %v127_v30, 0.0  ;;  %v209_v62 = vsel %vm199_vm0, %v131_v31, 0.0 }
  0x43   :  { %v156_v46 = vcombine.high %v148_v39, %v148_v39  ;;  %v157_v47 = vcombine.high %v149_v40, %v149_v40  ;;  %v165_v48 = vsel %vm164_vm1, %v148_v39, 0.0  ;;  %v168_v52 = vsel %vm164_vm1, %v149_v40, 0.0 }
  0x44   :  { %v206_v55 = vadd.f32 %v205_v49, %v204_v50  ;;  %v151_v56 = vmul.f32 %v143_v44, %v106_v43  ;;  %v158_v57 = vcombine.high %v150_v45, %v150_v45  ;;  %v172_v61 = vsel %vm164_vm1, %v150_v45, 0.0 }
  0x45   :  { %v166_v51 = vsel %vm164_vm1, %v156_v46, 0.0  ;;  %v170_v58 = vsel %vm164_vm1, %v157_v47, 0.0  ;;  %vm178_vm2 = vcmask 845824   ;;  %v211_v5 = vsel %vm199_vm0, %v135_v32, 0.0 }
  0x46   :  { %v167_v54 = vadd.f32 %v166_v51, %v165_v48  ;;  %v208_v60 = vadd.f32 %v207_v53, %v206_v55  ;;  %v159_v0 = vcombine.high %v151_v56, %v151_v56  ;;  %v174_v1 = vsel %vm164_vm1, %v158_v57, 0.0 }
  0x47   :  { %v176_v4 = vsel %vm164_vm1, %v151_v56, 0.0  ;;  %vm213_vm3 = vcmask 843776   ;;  %vm87_vm4 = vcmask 0   ;;  %v400_v13 = vmov 0.0  }
  0x48   :  { %v169_v59 = vadd.f32 %v168_v52, %v167_v54  ;;  %v210_v3 = vadd.f32 %v209_v62, %v208_v60  ;;  %v179_v7 = vsel %vm178_vm2, %v159_v0, 0.0  ;;  %v214_v10 = vsel %vm213_vm3, %v139_v33, 0.0  ;;  %88 = vst.msk [vmem:[#allocation8] sm:$0x1] %vm87_vm4, %v400_v13  ;;  %89 = vst.msk [vmem:[#allocation9] sm:$0x1] %vm87_vm4, %v400_v13 }
  0x4a   :  { %v171_v63 = vadd.f32 %v170_v58, %v169_v59  ;;  %v212_v9 = vadd.f32 %v211_v5, %v210_v3 }
  0x4c   :  { %v173_v2 = vadd.f32 %v172_v61, %v171_v63  ;;  %v215_v12 = vadd.f32 %v214_v10, %v212_v9 }
  0x4e   :  { %v175_v6 = vadd.f32 %v174_v1, %v173_v2 }
  0x4f   :  { %v226_v28 = vld [vmem:[#allocation8] sm:$0x1]  ;;  %v230_v31 = vld [vmem:[#allocation9] sm:$0x1] }
  0x50   :  { %v177_v8 = vadd.f32 %v176_v4, %v175_v6 }
  0x52   :  { %v180_v11 = vadd.f32 %v179_v7, %v177_v8 }
  0x54   :  { %181 = vadd.xlane.f32.xlu0 %v180_v11 }
  0x58   :  { %216 = vadd.xlane.f32.xlu0 %v215_v12 }
  0xe1   :  { %v182_v14 = vpop.xlane.xlu0 %181 }
  0xe2   :  { %v183_v15 = vrot.slane %v182_v14, 4 }
  0xe4   :  { %v184_v16 = vadd.f32 %v183_v15, %v182_v14 }
  0xe5   :  { %v217_v17 = vpop.xlane.xlu0 %216 }
  0xe6   :  { %v185_v18 = vrot.slane %v184_v16, 2  ;;  %v218_v19 = vrot.slane %v217_v17, 4 }
  0xe8   :  { %v219_v20 = vadd.f32 %v218_v19, %v217_v17  ;;  %v186_v21 = vadd.f32 %v185_v18, %v184_v16 }
  0xea   :  { %v220_v22 = vrot.slane %v219_v20, 2  ;;  %v187_v23 = vrot.slane %v186_v21, 1 }
  0xec   :  { %v221_v24 = vadd.f32 %v220_v22, %v219_v20  ;;  %v188_v25 = vadd.f32 %v187_v23, %v186_v21 }
  0xee   :  { %269 = vpush %v188_v25  ;;  %v222_v26 = vrot.slane %v221_v24, 1 }
  0xf0   :  { %v223_v27 = vadd.f32 %v222_v26, %v221_v24 }
  0xf2   :  { %271 = vpush %v223_v27 }
 0x11f   :  { %s270_s24 = spop %269 }
 0x120   :  { %v190_v29 = vstv %s270_s24 }
 0x121   :  { %v227_v30 = vadd.f32 %v226_v28, %v190_v29 }
 0x123   :  { %229 = vst.msk [vmem:[#allocation8] sm:$0x1] %vm87_vm4, %v227_v30  ;;  %s272_s27 = spop %271 }
 0x124   :  { %v225_v32 = vstv %s272_s27 }
 0x125   :  { %356 = shalt.err (!%p353_p0)
}
 0x126   :  { %s357_s6 = scalar_lea.hbm %s509_s3, 16 }
 0x127   :  { %p358_p1 = scmp.ne.s32.totalorder %s509_s3, %s357_s6  ;;  %p361_p2 = scmp.lt.u32.totalorder %s357_s6, %s509_s3 }
 0x129   :  { %p363_p3 = pnand %p361_p2, %p358_p1 }
 0x12b   :  { %366 = shalt.err (!%p363_p3)
}
 0x12c   :  { %242 = dma.vmem_to_hbm [thread:$0]  %s240_s23, 16, %s509_s3, [#allocation4]   ;;  %v231_v33 = vadd.f32 %v230_v31, %v225_v32 }
 0x12d   :  { %s367_s12 = scalar_lea.vmem %s250_s26, 16  ;;  %s371_s13 = scalar_lea.vmem %s250_s26, 32 }
 0x12e   :  { %232 = vst.msk [vmem:[#allocation9] sm:$0x1] %vm87_vm4, %v231_v33  ;;  %p368_p4 = scmp.ne.s32.totalorder %s250_s26, %s367_s12  ;;  %p372_p5 = scmp.lt.s32.totalorder %s250_s26, %s250_s26 }
 0x12f   :  { %p373_p6 = scmp.lt.s32.totalorder %s371_s13, %s367_s12 }
 0x131   :  { %p374_p7 = por %p373_p6, %p372_p5 }
 0x133   :  { %p375_p8 = pnand %p374_p7, %p368_p4 }
 0x135   :  { %378 = shalt.err (!%p375_p8)
}
 0x136   :  { %s379_s16 = scalar_lea.hbm %s510_s4, 16 }
 0x137   :  { %p380_p9 = scmp.ne.s32.totalorder %s510_s4, %s379_s16  ;;  %p383_p10 = scmp.lt.u32.totalorder %s379_s16, %s510_s4 }
 0x139   :  { %p385_p11 = pnand %p383_p10, %p380_p9 }
 0x13b   :  { %388 = shalt.err (!%p385_p11)
}
 0x13c   :  { %252 = dma.vmem_to_hbm [thread:$0]  %s250_s26, 16, %s510_s4, [#allocation10]  }
 0x13d   :  { %393 = dma.done.wait [#allocation4], 16  }
 0x13e   :  { %394 = vsyncadd [#allocation4], 4294967280 }
 0x13f   :  { %395 = dma.done.wait [#allocation10], 16  }
 0x140   :  { %396 = vsyncadd [#allocation10], 4294967280 }
 0x141   :  { %259 = vsyncpa [#allocation3], 1 }
 0x142   :  { %260 = vsyncpa [#allocation6], 1 }
 0x143   :  { %261 = vsyncpa [#allocation4], 1 }
 0x144   :  { %262 = vsyncpa [#allocation10], 1 }

</bundles_post_ra>
